<compile_context>
chip_gen: v7x
topology: tpu7x:2x2x1
jax: 0.10.0
libtpu: 0.0.40
codegen_flags: <defaults>
</compile_context>

<pallas_src>
import jax
import jax.numpy as jnp
from jax import lax
from jax.experimental import pallas as pl
from jax.experimental.pallas import tpu as pltpu

EPS = 1e-5


def _round_up(n, m):
    return ((n + m - 1) // m) * m


def _vmem_capacity_bytes():
    # Generation-aware VMEM capacity (v5e/v6e: 128 MiB, v7x: 64 MiB per TC).
    try:
        return int(pltpu.get_tpu_info().vmem_capacity_bytes)
    except Exception:
        return 64 * 1024 * 1024  # conservative fallback, valid everywhere


def _vmem_limit_bytes(tm, hp, x_dtype, w_dtype, out_dtype, single_buf_consts):
    isz = lambda d: jnp.dtype(d).itemsize
    const_bufs = 1 if single_buf_consts else 2
    need = (
        const_bufs * hp * hp * isz(w_dtype)   # resident W^T
        + 2 * tm * hp * isz(x_dtype)          # double-buffered x row tile
        + 2 * tm * hp * isz(out_dtype)        # double-buffered out row tile
        + const_bufs * 3 * hp * 4             # packed bias/gamma/beta
        + 6 * tm * hp * 4                     # f32 intermediates (dot, h, h*h, normed, ...)
    )
    cap = _vmem_capacity_bytes() - 4 * 1024 * 1024  # leave headroom for the compiler
    return int(min(max(need, 32 * 1024 * 1024), cap))


def _make_kernel(true_h, matmul_in_bf16):
    inv_h = 1.0 / float(true_h)  # divide by the *unpadded* hidden size

    def kernel(x_ref, w_ref, p_ref, o_ref):
        # x_ref: (TM, Hp) row tile, native dtype (f32 or bf16)
        # w_ref: (Hp, Hp) weight, pre-transposed so x @ w == x @ W^T (torch Linear)
        # p_ref: (3, Hp)  f32 packed [linear bias; ln gamma; ln beta]
        x = x_ref[...]
        w = w_ref[...]

        # Sublayer: Linear on the MXU, f32 accumulation.
        if matmul_in_bf16 and x.dtype == jnp.float32:
            dot = jnp.dot(x.astype(jnp.bfloat16), w.astype(jnp.bfloat16),
                          preferred_element_type=jnp.float32)
        else:
            dot = jnp.dot(x, w, preferred_element_type=jnp.float32)

        p = p_ref[...]
        bias, gamma, beta = p[0:1, :], p[1:2, :], p[2:3, :]

        # Residual add fused with the linear bias, all in f32 on the VPU.
        h = x.astype(jnp.float32) + dot + bias

        # LayerNorm over the lane dim.  Single pass: padded columns are exact
        # zeros so they contribute nothing to s1/s2; divisor is the true H.
        s1 = jnp.sum(h, axis=-1, keepdims=True)
        s2 = jnp.sum(h * h, axis=-1, keepdims=True)
        mean = s1 * inv_h
        var = jnp.maximum(s2 * inv_h - mean * mean, 0.0)  # clamp f32 cancellation
        normed = (h - mean) * lax.rsqrt(var + EPS)

        o_ref[...] = (normed * gamma + beta).astype(o_ref.dtype)

    return kernel


def postnorm_res_unit(x, w, b, gamma, beta, *, target_block_bytes=2 << 20,
                      matmul_in_bf16=False):
    """x: (R, H) tokens; w: (H, H) pre-transposed Linear weight (x @ w == x @ W^T)."""
    R, H = x.shape
    assert w.shape == (H, H)

    # Pad the hidden (lane) dim to a multiple of 128: unmasked full-lane stores
    # on the writeback path.  Zero padding is exact for the math (see kernel).
    Hp = _round_up(H, 128)
    if Hp != H:
        pad_h = Hp - H
        x = jnp.pad(x, ((0, 0), (0, pad_h)))
        w = jnp.pad(w, ((0, pad_h), (0, pad_h)))
        b = jnp.pad(b, (0, pad_h))
        gamma = jnp.pad(gamma, (0, pad_h))
        beta = jnp.pad(beta, (0, pad_h))

    # Row tile scaled with H: target ~2 MiB of x per block so DMA, not the
    # ~0.35 us per-grid-step overhead, dominates.  Sublane multiple 16 for bf16.
    isz = jnp.dtype(x.dtype).itemsize
    sub = 16 if x.dtype == jnp.bfloat16 else 8
    tm_target = max(target_block_bytes // (Hp * isz), 1)
    tm_target = min(max(_round_up(tm_target, sub), 256), 2048)
    tm_eff = min(tm_target, _round_up(R, sub))
    R_pad = _round_up(R, tm_eff)
    if R_pad != R:
        x = jnp.pad(x, ((0, R_pad - R), (0, 0)))

    params = jnp.stack(
        [b.astype(jnp.float32), gamma.astype(jnp.float32), beta.astype(jnp.float32)],
        axis=0)  # (3, Hp)

    kernel = _make_kernel(H, matmul_in_bf16)

    def _run(single_buf_consts):
        # Constant-index blocks (W^T, params) need only one buffer.
        const_kwargs = (
            dict(pipeline_mode=pl.Buffered(1)) if single_buf_consts else {})
        grid_spec = pltpu.PrefetchScalarGridSpec(
            num_scalar_prefetch=0,
            grid=(R_pad // tm_eff,),
            in_specs=[
                pl.BlockSpec((tm_eff, Hp), lambda i: (i, 0)),              # x row tile
                pl.BlockSpec((Hp, Hp), lambda i: (0, 0), **const_kwargs),  # W^T, resident
                pl.BlockSpec((3, Hp), lambda i: (0, 0), **const_kwargs),   # bias/gamma/beta
            ],
            out_specs=pl.BlockSpec((tm_eff, Hp), lambda i: (i, 0)),
        )
        return pl.pallas_call(
            kernel,
            out_shape=jax.ShapeDtypeStruct((R_pad, Hp), x.dtype),
            grid_spec=grid_spec,
            compiler_params=pltpu.CompilerParams(
                # "parallel" on the row axis lets v7x's two TensorCores split
                # the grid (neutral on single-TC v5e/v6e).
                dimension_semantics=("parallel",),
                vmem_limit_bytes=_vmem_limit_bytes(
                    tm_eff, Hp, x.dtype, w.dtype, x.dtype, single_buf_consts),
            ),
        )(x, w, params)

    try:
        out = _run(True)    # single-buffer the constant blocks
    except Exception:       # compat guard: Pallas build without pipeline_mode support
        out = _run(False)

    return out[:R, :H]


def reference(x, w, b, gamma, beta):
    xf = x.astype(jnp.float32)
    wf = w.astype(jnp.float32)
    h = xf + (xf @ wf + b.astype(jnp.float32))
    mean = jnp.mean(h, axis=-1, keepdims=True)
    var = jnp.mean((h - mean) ** 2, axis=-1, keepdims=True)
    y = (h - mean) * lax.rsqrt(var + EPS)
    return y * gamma.astype(jnp.float32) + beta.astype(jnp.float32)


if __name__ == "__main__":
    batch, seq, hidden = 2, 8, 128   # lane-dense hidden (multiple of 128)
    key = jax.random.PRNGKey(0)
    kx, kw, kb, kg, kbe = jax.random.split(key, 5)

    # Deterministic parameter init (synthetic, not a checkpoint load).
    x = jax.random.normal(kx, (batch, seq, hidden), dtype=jnp.float32)
    W = jax.random.normal(kw, (hidden, hidden), dtype=jnp.float32) * 0.05  # torch (out, in)
    b = jax.random.normal(kb, (hidden,), dtype=jnp.float32) * 0.05
    gamma = 1.0 + 0.1 * jax.random.normal(kg, (hidden,), dtype=jnp.float32)
    beta = 0.1 * jax.random.normal(kbe, (hidden,), dtype=jnp.float32)

    x2d = x.reshape(batch * seq, hidden)   # layout: [batch*seq, hidden]
    w_t = W.T                              # x @ w_t == x @ W^T (torch Linear)

    # float32 path (matches torch defaults).
    out_f32 = jax.block_until_ready(postnorm_res_unit(x2d, w_t, b, gamma, beta))
    ref_f32 = reference(x2d, w_t, b, gamma, beta)
    assert out_f32.shape == (batch * seq, hidden)
    assert jnp.allclose(out_f32, ref_f32, atol=1e-4, rtol=1e-4), "f32 mismatch vs reference"

    # bf16 activands/weights feed the MXU directly (f32 accumulation and f32
    # LayerNorm in-kernel).  The reference matmuls in f32, so the loose
    # tolerance intentionally covers the bf16-vs-f32 matmul difference.
    x_bf = x2d.astype(jnp.bfloat16)
    w_bf = w_t.astype(jnp.bfloat16)
    out_bf = jax.block_until_ready(postnorm_res_unit(x_bf, w_bf, b, gamma, beta))
    ref_bf = reference(x_bf, w_bf, b, gamma, beta)
    assert out_bf.dtype == jnp.bfloat16
    assert jnp.allclose(out_bf.astype(jnp.float32), ref_bf, atol=5e-2, rtol=5e-2), \
        "bf16 mismatch vs reference"

    # Non-multiple-of-128 hidden exercises the in-wrapper lane-padding path.
    h2 = 96
    x3 = jax.random.normal(kx, (batch * seq, h2), dtype=jnp.float32)
    W2 = jax.random.normal(kw, (h2, h2), dtype=jnp.float32) * 0.05
    b2 = jax.random.normal(kb, (h2,), dtype=jnp.float32) * 0.05
    g2 = 1.0 + 0.1 * jax.random.normal(kg, (h2,), dtype=jnp.float32)
    be2 = 0.1 * jax.random.normal(kbe, (h2,), dtype=jnp.float32)
    out_pad = jax.block_until_ready(postnorm_res_unit(x3, W2.T, b2, g2, be2))
    assert out_pad.shape == (batch * seq, h2)
    assert jnp.allclose(out_pad, reference(x3, W2.T, b2, g2, be2), atol=1e-4, rtol=1e-4), \
        "padded-H mismatch vs reference"

    out3d = out_f32.reshape(batch, seq, hidden)
    assert out3d.shape == (batch, seq, hidden)
    print("KERNEL_OK")
</pallas_src>

<mosaic_0001>
module attributes {stable_mosaic.version = 11 : i64} {
  func.func @kernel(%arg0: i32, %arg1: memref<16x128xf32, #tpu.memory_space<vmem>>, %arg2: memref<128x128xf32, #tpu.memory_space<vmem>>, %arg3: memref<3x128xf32, #tpu.memory_space<vmem>>, %arg4: memref<16x128xf32, #tpu.memory_space<vmem>>) attributes {dimension_semantics = [#tpu.dimension_semantics<parallel>], iteration_bounds = array<i64: 1>, scalar_prefetch = 0 : i64, scratch_operands = 0 : i64, tpu.core_type = #tpu.core_type<tc>, window_params = [{transform_indices = @transform_0, window_bounds = array<i64: 16, 128>}, {pipeline_mode = #tpu.pipeline_mode<synchronous>, transform_indices = @transform_1, window_bounds = array<i64: 128, 128>}, {pipeline_mode = #tpu.pipeline_mode<synchronous>, transform_indices = @transform_2, window_bounds = array<i64: 3, 128>}, {transform_indices = @transform_3, window_bounds = array<i64: 16, 128>}]} {
    %c0 = arith.constant 0 : index
    %c0_0 = arith.constant 0 : index
    %0 = vector.load %arg1[%c0, %c0_0] : memref<16x128xf32, #tpu.memory_space<vmem>>, vector<16x128xf32>
    %c0_1 = arith.constant 0 : index
    %c0_2 = arith.constant 0 : index
    %1 = vector.load %arg2[%c0_1, %c0_2] : memref<128x128xf32, #tpu.memory_space<vmem>>, vector<128x128xf32>
    %cst = arith.constant dense<0.000000e+00> : vector<16x128xf32>
    %2 = tpu.matmul %0, %1, %cst {dimension_numbers = #tpu.dot_dimension_numbers<[1], [0], [0], [1], [0, 0, 1, 1], [], []>} : vector<16x128xf32>, vector<128x128xf32>, vector<16x128xf32> -> vector<16x128xf32>
    %c0_3 = arith.constant 0 : index
    %c0_4 = arith.constant 0 : index
    %3 = vector.load %arg3[%c0_3, %c0_4] : memref<3x128xf32, #tpu.memory_space<vmem>>, vector<3x128xf32>
    %4 = vector.extract_strided_slice %3 {offsets = [0, 0], sizes = [1, 128], strides = [1, 1]} : vector<3x128xf32> to vector<1x128xf32>
    %5 = vector.extract_strided_slice %3 {offsets = [1, 0], sizes = [1, 128], strides = [1, 1]} : vector<3x128xf32> to vector<1x128xf32>
    %6 = vector.extract_strided_slice %3 {offsets = [2, 0], sizes = [1, 128], strides = [1, 1]} : vector<3x128xf32> to vector<1x128xf32>
    %7 = arith.addf %0, %2 : vector<16x128xf32>
    %8 = vector.broadcast %4 : vector<1x128xf32> to vector<16x128xf32>
    %9 = arith.addf %7, %8 : vector<16x128xf32>
    %cst_5 = arith.constant dense<0.000000e+00> : vector<16xf32>
    %10 = vector.multi_reduction <add>, %9, %cst_5 [1] : vector<16x128xf32> to vector<16xf32>
    %11 = vector.shape_cast %10 : vector<16xf32> to vector<16x1xf32>
    %12 = arith.mulf %9, %9 : vector<16x128xf32>
    %cst_6 = arith.constant dense<0.000000e+00> : vector<16xf32>
    %13 = vector.multi_reduction <add>, %12, %cst_6 [1] : vector<16x128xf32> to vector<16xf32>
    %14 = vector.shape_cast %13 : vector<16xf32> to vector<16x1xf32>
    %cst_7 = arith.constant 7.812500e-03 : f32
    %15 = vector.broadcast %cst_7 : f32 to vector<16x1xf32>
    %16 = arith.mulf %11, %15 : vector<16x1xf32>
    %cst_8 = arith.constant 7.812500e-03 : f32
    %17 = vector.broadcast %cst_8 : f32 to vector<16x1xf32>
    %18 = arith.mulf %14, %17 : vector<16x1xf32>
    %19 = arith.mulf %16, %16 : vector<16x1xf32>
    %20 = arith.subf %18, %19 : vector<16x1xf32>
    %cst_9 = arith.constant 0.000000e+00 : f32
    %21 = vector.broadcast %cst_9 : f32 to vector<16x1xf32>
    %22 = arith.maximumf %20, %21 : vector<16x1xf32>
    %23 = vector.broadcast %16 : vector<16x1xf32> to vector<16x128xf32>
    %24 = arith.subf %9, %23 : vector<16x128xf32>
    %cst_10 = arith.constant 9.99999974E-6 : f32
    %25 = vector.broadcast %cst_10 : f32 to vector<16x1xf32>
    %26 = arith.addf %22, %25 : vector<16x1xf32>
    %27 = math.rsqrt %26 : vector<16x1xf32>
    %28 = vector.broadcast %27 : vector<16x1xf32> to vector<16x128xf32>
    %29 = arith.mulf %24, %28 : vector<16x128xf32>
    %30 = vector.broadcast %5 : vector<1x128xf32> to vector<16x128xf32>
    %31 = arith.mulf %29, %30 : vector<16x128xf32>
    %32 = vector.broadcast %6 : vector<1x128xf32> to vector<16x128xf32>
    %33 = arith.addf %31, %32 : vector<16x128xf32>
    %c0_11 = arith.constant 0 : index
    %c0_12 = arith.constant 0 : index
    %34 = vector.load %arg4[%c0_11, %c0_12] : memref<16x128xf32, #tpu.memory_space<vmem>>, vector<16x128xf32>
    tpu.vector_store %arg4[%c0_11, %c0_12], %33 {strides = array<i32>} : memref<16x128xf32, #tpu.memory_space<vmem>>, vector<16x128xf32>,
    return
  }
  func.func @transform_0(%arg0: i32) -> (i32, i32) {
    %c0_i32 = arith.constant 0 : i32
    %c0_i32_0 = arith.constant 0 : i32
    return %arg0, %c0_i32 : i32, i32
  }
  func.func @transform_1(%arg0: i32) -> (i32, i32) {
    %c0_i32 = arith.constant 0 : i32
    %c0_i32_0 = arith.constant 0 : i32
    %c0_i32_1 = arith.constant 0 : i32
    return %c0_i32, %c0_i32_0 : i32, i32
  }
  func.func @transform_2(%arg0: i32) -> (i32, i32) {
    %c0_i32 = arith.constant 0 : i32
    %c0_i32_0 = arith.constant 0 : i32
    %c0_i32_1 = arith.constant 0 : i32
    return %c0_i32, %c0_i32_0 : i32, i32
  }
  func.func @transform_3(%arg0: i32) -> (i32, i32) {
    %c0_i32 = arith.constant 0 : i32
    %c0_i32_0 = arith.constant 0 : i32
    return %arg0, %c0_i32 : i32, i32
  }
}

module attributes {stable_mosaic.version = 11 : i64} {
  func.func @kernel(%arg0: i32, %arg1: memref<16x128xf32, #tpu.memory_space<vmem>>, %arg2: memref<128x128xf32, #tpu.memory_space<vmem>>, %arg3: memref<3x128xf32, #tpu.memory_space<vmem>>, %arg4: memref<16x128xf32, #tpu.memory_space<vmem>>) attributes {dimension_semantics = [#tpu.dimension_semantics<parallel>], iteration_bounds = array<i64: 1>, scalar_prefetch = 0 : i64, scratch_operands = 0 : i64, tpu.core_type = #tpu.core_type<tc>, window_params = [{transform_indices = @transform_0, window_bounds = array<i64: 16, 128>}, {pipeline_mode = #tpu.pipeline_mode<synchronous>, transform_indices = @transform_1, window_bounds = array<i64: 128, 128>}, {pipeline_mode = #tpu.pipeline_mode<synchronous>, transform_indices = @transform_2, window_bounds = array<i64: 3, 128>}, {transform_indices = @transform_3, window_bounds = array<i64: 16, 128>}]} {
    %c0 = arith.constant 0 : index
    %c0_0 = arith.constant 0 : index
    %0 = vector.load %arg1[%c0, %c0_0] : memref<16x128xf32, #tpu.memory_space<vmem>>, vector<16x128xf32>
    %c0_1 = arith.constant 0 : index
    %c0_2 = arith.constant 0 : index
    %1 = vector.load %arg2[%c0_1, %c0_2] : memref<128x128xf32, #tpu.memory_space<vmem>>, vector<128x128xf32>
    %cst = arith.constant dense<0.000000e+00> : vector<16x128xf32>
    %2 = tpu.matmul %0, %1, %cst {dimension_numbers = #tpu.dot_dimension_numbers<[1], [0], [0], [1], [0, 0, 1, 1], [], []>} : vector<16x128xf32>, vector<128x128xf32>, vector<16x128xf32> -> vector<16x128xf32>
    %c0_3 = arith.constant 0 : index
    %c0_4 = arith.constant 0 : index
    %3 = vector.load %arg3[%c0_3, %c0_4] : memref<3x128xf32, #tpu.memory_space<vmem>>, vector<3x128xf32>
    %4 = vector.extract_strided_slice %3 {offsets = [0, 0], sizes = [1, 128], strides = [1, 1]} : vector<3x128xf32> to vector<1x128xf32>
    %5 = vector.extract_strided_slice %3 {offsets = [1, 0], sizes = [1, 128], strides = [1, 1]} : vector<3x128xf32> to vector<1x128xf32>
    %6 = vector.extract_strided_slice %3 {offsets = [2, 0], sizes = [1, 128], strides = [1, 1]} : vector<3x128xf32> to vector<1x128xf32>
    %7 = arith.addf %0, %2 : vector<16x128xf32>
    %8 = vector.broadcast %4 : vector<1x128xf32> to vector<16x128xf32>
    %9 = arith.addf %7, %8 : vector<16x128xf32>
    %cst_5 = arith.constant dense<0.000000e+00> : vector<16xf32>
    %10 = vector.multi_reduction <add>, %9, %cst_5 [1] : vector<16x128xf32> to vector<16xf32>
    %11 = vector.shape_cast %10 : vector<16xf32> to vector<16x1xf32>
    %12 = arith.mulf %9, %9 : vector<16x128xf32>
    %cst_6 = arith.constant dense<0.000000e+00> : vector<16xf32>
    %13 = vector.multi_reduction <add>, %12, %cst_6 [1] : vector<16x128xf32> to vector<16xf32>
    %14 = vector.shape_cast %13 : vector<16xf32> to vector<16x1xf32>
    %cst_7 = arith.constant 7.812500e-03 : f32
    %15 = vector.broadcast %cst_7 : f32 to vector<16x1xf32>
    %16 = arith.mulf %11, %15 : vector<16x1xf32>
    %cst_8 = arith.constant 7.812500e-03 : f32
    %17 = vector.broadcast %cst_8 : f32 to vector<16x1xf32>
    %18 = arith.mulf %14, %17 : vector<16x1xf32>
    %19 = arith.mulf %16, %16 : vector<16x1xf32>
    %20 = arith.subf %18, %19 : vector<16x1xf32>
    %cst_9 = arith.constant 0.000000e+00 : f32
    %21 = vector.broadcast %cst_9 : f32 to vector<16x1xf32>
    %22 = arith.maximumf %20, %21 : vector<16x1xf32>
    %23 = vector.broadcast %16 : vector<16x1xf32> to vector<16x128xf32>
    %24 = arith.subf %9, %23 : vector<16x128xf32>
    %cst_10 = arith.constant 9.99999974E-6 : f32
    %25 = vector.broadcast %cst_10 : f32 to vector<16x1xf32>
    %26 = arith.addf %22, %25 : vector<16x1xf32>
    %27 = math.rsqrt %26 : vector<16x1xf32>
    %28 = vector.broadcast %27 : vector<16x1xf32> to vector<16x128xf32>
    %29 = arith.mulf %24, %28 : vector<16x128xf32>
    %30 = vector.broadcast %5 : vector<1x128xf32> to vector<16x128xf32>
    %31 = arith.mulf %29, %30 : vector<16x128xf32>
    %32 = vector.broadcast %6 : vector<1x128xf32> to vector<16x128xf32>
    %33 = arith.addf %31, %32 : vector<16x128xf32>
    %c0_11 = arith.constant 0 : index
    %c0_12 = arith.constant 0 : index
    %34 = vector.load %arg4[%c0_11, %c0_12] : memref<16x128xf32, #tpu.memory_space<vmem>>, vector<16x128xf32>
    tpu.vector_store %arg4[%c0_11, %c0_12], %33 {strides = array<i32>} : memref<16x128xf32, #tpu.memory_space<vmem>>, vector<16x128xf32>,
    return
  }
  func.func @transform_0(%arg0: i32) -> (i32, i32) {
    %c0_i32 = arith.constant 0 : i32
    %c0_i32_0 = arith.constant 0 : i32
    return %arg0, %c0_i32 : i32, i32
  }
  func.func @transform_1(%arg0: i32) -> (i32, i32) {
    %c0_i32 = arith.constant 0 : i32
    %c0_i32_0 = arith.constant 0 : i32
    %c0_i32_1 = arith.constant 0 : i32
    return %c0_i32, %c0_i32_0 : i32, i32
  }
  func.func @transform_2(%arg0: i32) -> (i32, i32) {
    %c0_i32 = arith.constant 0 : i32
    %c0_i32_0 = arith.constant 0 : i32
    %c0_i32_1 = arith.constant 0 : i32
    return %c0_i32, %c0_i32_0 : i32, i32
  }
  func.func @transform_3(%arg0: i32) -> (i32, i32) {
    %c0_i32 = arith.constant 0 : i32
    %c0_i32_0 = arith.constant 0 : i32
    return %arg0, %c0_i32 : i32, i32
  }
}

</mosaic_0001>

<bundles_post_ra>
// kernel: tpu_custom_call.1
= control target key start
LH: loop header
LB: loop body
LE: loop exit
PB: predicated region body
PF: predicated region fallthrough
CT: control target
= control target key end

     0   :  { %8 = vsyncpa [#allocation3], 0  ;;  %s444_s0 = inlined_call_operand.hbm [shape: f32[16,128], index: 0, kind: input, shape index: {}]   ;;  %s445_s1 = inlined_call_operand.hbm [shape: f32[128,128], index: 1, kind: input, shape index: {}]   ;;  %s446_s2 = inlined_call_operand.vmem [shape: f32[3,128], index: 2, kind: input, shape index: {}]   ;;  %s447_s3 = inlined_call_operand.hbm [shape: f32[16,128], index: 3, kind: output, shape index: {}]  }
   0x1   :  { %9 = vsyncpa [#allocation6], 0 }
   0x2   :  { %10 = vsyncpa [#allocation4], 0  ;;  %s371_s12 = smov [#allocation2]   ;;  %s299_s16 = scalar_lea.hbm %s444_s0, 256 }
   0x3   :  { %s16_s13 = sshll.u32 %s371_s12, 4  ;;  %p300_p0 = scmp.ne.s32.totalorder %s444_s0, %s299_s16  ;;  %s17_s13 = int_to_ptr.vmem [resolvable:$true] %s16_s13 }
   0x4   :  { %p303_p1 = scmp.lt.u32.totalorder %s299_s16, %s444_s0 }
   0x6   :  { %p305_p2 = pnand %p303_p1, %p300_p0 }
   0x8   :  { %308 = shalt.err (!%p305_p2)
}
   0x9   :  { %s309_s21 = scalar_lea.vmem %s17_s13, 256  ;;  %p314_p4 = scmp.lt.s32.totalorder %s17_s13, %s17_s13 }
   0xa   :  { %p310_p3 = scmp.ne.s32.totalorder %s17_s13, %s309_s21  ;;  %p315_p5 = scmp.lt.s32.totalorder %s309_s21, %s309_s21 }
   0xc   :  { %p316_p6 = por %p315_p5, %p314_p4 }
   0xe   :  { %p317_p7 = pnand %p316_p6, %p310_p3 }
  0x10   :  { %320 = shalt.err (!%p317_p7)
}
  0x11   :  { %s372_s22 = smov 128   ;;  %s373_s23 = smov 8  }
  0x12   :  { %22 = dma.hbm_to_vmem [thread:$0]  %s444_s0, 256, %s17_s13, [#allocation3], %s372_s22, %s372_s22, %s373_s23  }
  0x13   :  { %s374_s26 = smov [#allocation5]   ;;  %s321_s30 = scalar_lea.hbm %s445_s1, 2048 }
  0x14   :  { %s28_s27 = sshll.u32 %s374_s26, 4  ;;  %p322_p8 = scmp.ne.s32.totalorder %s445_s1, %s321_s30  ;;  %s29_s27 = int_to_ptr.vmem [resolvable:$true] %s28_s27 }
  0x15   :  { %p325_p9 = scmp.lt.u32.totalorder %s321_s30, %s445_s1 }
  0x17   :  { %p327_p10 = pnand %p325_p9, %p322_p8 }
  0x19   :  { %330 = shalt.err (!%p327_p10)
}
  0x1a   :  { %s331_s8 = scalar_lea.vmem %s29_s27, 2048  ;;  %p336_p12 = scmp.lt.s32.totalorder %s29_s27, %s29_s27 }
  0x1b   :  { %p332_p11 = scmp.ne.s32.totalorder %s29_s27, %s331_s8  ;;  %p337_p13 = scmp.lt.s32.totalorder %s331_s8, %s331_s8 }
  0x1d   :  { %p338_p0 = por %p337_p13, %p336_p12 }
  0x1f   :  { %p339_p1 = pnand %p338_p0, %p332_p11 }
  0x21   :  { %342 = shalt.err (!%p339_p1)
}
  0x22   :  { %34 = dma.hbm_to_vmem [thread:$0]  %s445_s1, 2048, %s29_s27, [#allocation6], %s372_s22, %s372_s22, %s373_s23  }
  0x23   :  { %365 = dma.done.wait [#allocation3], 256  }
  0x24   :  { %366 = vsyncadd [#allocation3], 4294967040 }
  0x25   :  { %367 = dma.done.wait [#allocation6], 2048  }
  0x26   :  { %368 = vsyncadd [#allocation6], 4294965248  ;;  %v45_v0 = vld [vmem:[#allocation5] sm:$0xff]  ;;  %v46_v1 = vld [vmem:[#allocation5 + $0x8] sm:$0xff]  ;;  %v139_v26 = vlaneseq }
  0x27   :  { %v47_v2 = vld [vmem:[#allocation5 + $0x10] sm:$0xff]  ;;  %v258_v3 = vpack.c.bf16 %v46_v1, %v45_v0  ;;  %v48_v4 = vld [vmem:[#allocation5 + $0x18] sm:$0xff]  ;;  %v49_v6 = vld [vmem:[#allocation5 + $0x20] sm:$0xff] }
  0x28   :  { %v262_v5 = vpack.c.bf16 %v48_v4, %v47_v2  ;;  %v50_v7 = vld [vmem:[#allocation5 + $0x28] sm:$0xff]  ;;  %v43_v9 = vld [vmem:[#allocation2] sm:$0xff]  ;;  %v52_v11 = vld [vmem:[#allocation5 + $0x38] sm:$0xff]  ;;  %v140_v27 = vshrl.u32 %v139_v26, 7 }
  0x29   :  { %259 = vmatprep.subr.bf16.mxu0 %v258_v3  ;;  %v266_v8 = vpack.c.bf16 %v50_v7, %v49_v6  ;;  %v51_v10 = vld [vmem:[#allocation5 + $0x30] sm:$0xff]  ;;  %255 = vmatprep.mubr.f32.mxu0 %v43_v9  ;;  %v53_v13 = vld [vmem:[#allocation5 + $0x40] sm:$0xff]  ;;  %v54_v14 = vld [vmem:[#allocation5 + $0x48] sm:$0xff] }
  0x2a   :  { %261 = vmatpush3.bf16.msra.mxu0 %v258_v3  ;;  %v270_v12 = vpack.c.bf16 %v52_v11, %v51_v10  ;;  %v274_v15 = vpack.c.bf16 %v54_v14, %v53_v13  ;;  %v55_v16 = vld [vmem:[#allocation5 + $0x50] sm:$0xff]  ;;  %v56_v17 = vld [vmem:[#allocation5 + $0x58] sm:$0xff]  ;;  %v57_v19 = vld [vmem:[#allocation5 + $0x60] sm:$0xff]  ;;  %v141_v28 = vsub.s32 0, %v140_v27  ;;  %v175_v55 = vsub.s32 1, %v140_v27 }
  0x2b   :  { %263 = vmatprep.subr.bf16.mxu0 %v262_v5  ;;  %v278_v18 = vpack.c.bf16 %v56_v17, %v55_v16  ;;  %v58_v20 = vld [vmem:[#allocation5 + $0x68] sm:$0xff]  ;;  %v59_v22 = vld [vmem:[#allocation5 + $0x70] sm:$0xff]  ;;  %v60_v23 = vld [vmem:[#allocation5 + $0x78] sm:$0xff]  ;;  %v181_v56 = vsub.s32 2, %v140_v27 }
  0x2c   :  { %v282_v21 = vpack.c.bf16 %v58_v20, %v57_v19  ;;  %v286_v24 = vpack.c.bf16 %v60_v23, %v59_v22  ;;  %v44_v25 = vld [vmem:[#allocation2 + $0x8] sm:$0xff]  ;;  %v136_v29 = vld [vmem:[%s446_s2] sm:$0x7]  ;;  %s375_s2 = smov [#allocation7]  }
  0x2d   :  { %v142_v31 = vrot.slane %v136_v29, %v141_v28  ;;  %v176_v57 = vrot.slane %v136_v29, %v175_v55  ;;  %v182_v61 = vrot.slane %v136_v29, %v181_v56  ;;  %s192_s11 = sshll.u32 %s375_s2, 4  ;;  %s193_s11 = int_to_ptr.vmem [resolvable:$true] %s192_s11 }
  0x2e   :  { %265 = vmatpush3.bf16.msra.mxu0 %v262_v5  ;;  %s343_s12 = scalar_lea.vmem %s193_s11, 256  ;;  %p348_p3 = scmp.lt.s32.totalorder %s193_s11, %s193_s11 }
  0x2f   :  { %267 = vmatprep.subr.bf16.mxu0 %v266_v8  ;;  %p344_p2 = scmp.ne.s32.totalorder %s193_s11, %s343_s12  ;;  %p349_p4 = scmp.lt.s32.totalorder %s343_s12, %s343_s12 }
  0x31   :  { %p350_p5 = por %p349_p4, %p348_p3 }
  0x32   :  { %269 = vmatpush3.bf16.msra.mxu0 %v266_v8 }
  0x33   :  { %271 = vmatprep.subr.bf16.mxu0 %v270_v12  ;;  %p351_p6 = pnand %p350_p5, %p344_p2 }
  0x36   :  { %273 = vmatpush3.bf16.msra.mxu0 %v270_v12 }
  0x37   :  { %275 = vmatprep.subr.bf16.mxu0 %v274_v15 }
  0x3a   :  { %277 = vmatpush3.bf16.msra.mxu0 %v274_v15 }
  0x3b   :  { %279 = vmatprep.subr.bf16.mxu0 %v278_v18 }
  0x3e   :  { %281 = vmatpush3.bf16.msra.mxu0 %v278_v18 }
  0x3f   :  { %283 = vmatprep.subr.bf16.mxu0 %v282_v21 }
  0x42   :  { %285 = vmatpush3.bf16.msra.mxu0 %v282_v21 }
  0x43   :  { %287 = vmatprep.subr.bf16.mxu0 %v286_v24 }
  0x46   :  { %289 = vmatpush3.bf16.msra.mxu0 %v286_v24 }
  0x49   :  { %256 = vmatmul.mubr.f32.vlgmr.msra.gmra.mrb[0].mxu0 %v44_v25 }
 0x11c   :  { %v257_v30 = vpop.f32.mrb[0].mxu0 }
 0x11d   :  { %v127_v32 = vpop.f32.mrb[1].mxu0  ;;  %v138_v33 = vadd.f32 %v257_v30, %v44_v25 }
 0x11e   :  { %v137_v34 = vadd.f32 %v127_v32, %v43_v9 }
 0x11f   :  { %v144_v36 = vadd.f32 %v142_v31, %v138_v33 }
 0x120   :  { %v143_v35 = vadd.f32 %v142_v31, %v137_v34 }
 0x121   :  { %v150_v38 = vmul.f32 %v144_v36, %v144_v36 }
 0x122   :  { %145 = vadd.xlane.f32.xlu0 %v143_v35  ;;  %v149_v37 = vmul.f32 %v143_v35, %v143_v35 }
 0x124   :  { %151 = vadd.xlane.f32.xlu1 %v149_v37 }
 0x126   :  { %147 = vadd.xlane.f32.xlu0 %v144_v36 }
 0x128   :  { %153 = vadd.xlane.f32.xlu1 %v150_v38 }
 0x1af   :  { %v146_v39 = vpop.xlane.xlu0 %145 }
 0x1b0   :  { %v155_v40 = vmul.f32 0.0078125, %v146_v39 }
 0x1b1   :  { %v152_v41 = vpop.xlane.xlu1 %151 }
 0x1b2   :  { %v159_v42 = vmul.f32 %v155_v40, %v155_v40  ;;  %v157_v43 = vmul.f32 0.0078125, %v152_v41  ;;  %v165_v58 = vsub.f32 %v143_v35, %v155_v40 }
 0x1b3   :  { %v148_v44 = vpop.xlane.xlu0 %147 }
 0x1b4   :  { %v161_v45 = vsub.f32 %v157_v43, %v159_v42  ;;  %v156_v46 = vmul.f32 0.0078125, %v148_v44 }
 0x1b5   :  { %v154_v47 = vpop.xlane.xlu1 %153 }
 0x1b6   :  { %v163_v48 = vmax.f32 %v161_v45, 0.0  ;;  %v160_v49 = vmul.f32 %v156_v46, %v156_v46  ;;  %v158_v50 = vmul.f32 0.0078125, %v154_v47  ;;  %v166_v62 = vsub.f32 %v144_v36, %v156_v46 }
 0x1b8   :  { %v167_v51 = vadd.f32 1e-05, %v163_v48  ;;  %v162_v52 = vsub.f32 %v158_v50, %v160_v49 }
 0x1ba   :  { %295 = vrsqrt.f32 %v167_v51  ;;  %v164_v53 = vmax.f32 %v162_v52, 0.0 }
 0x1bc   :  { %v168_v54 = vadd.f32 1e-05, %v164_v53 }
 0x1be   :  { %297 = vrsqrt.f32 %v168_v54 }
 0x1c4   :  { %v296_v59 = vpop.eup %295 }
 0x1c5   :  { %v171_v60 = vmul.f32 %v296_v59, %v165_v58 }
 0x1c7   :  { %v177_v63 = vmul.f32 %v176_v57, %v171_v60 }
 0x1c8   :  { %v298_v0 = vpop.eup %297 }
 0x1c9   :  { %v172_v1 = vmul.f32 %v298_v0, %v166_v62  ;;  %v183_v2 = vadd.f32 %v182_v61, %v177_v63 }
 0x1cb   :  { %v178_v3 = vmul.f32 %v176_v57, %v172_v1  ;;  %185 = vst [vmem:[#allocation7] sm:$0xff] %v183_v2 }
 0x1cd   :  { %v184_v4 = vadd.f32 %v182_v61, %v178_v3 }
 0x1cf   :  { %186 = vst [vmem:[#allocation7 + $0x8] sm:$0xff] %v184_v4 }
 0x1d0   :  { %354 = shalt.err (!%p351_p6)
}
 0x1d1   :  { %s355_s15 = scalar_lea.hbm %s447_s3, 256 }
 0x1d2   :  { %p356_p7 = scmp.ne.s32.totalorder %s447_s3, %s355_s15  ;;  %p359_p8 = scmp.lt.u32.totalorder %s355_s15, %s447_s3 }
 0x1d4   :  { %p361_p9 = pnand %p359_p8, %p356_p7 }
 0x1d6   :  { %364 = shalt.err (!%p361_p9)
}
 0x1d7   :  { %198 = dma.vmem_to_hbm [thread:$0]  %s193_s11, 256, %s447_s3, [#allocation4], %s372_s22, %s372_s22, %s373_s23  }
 0x1d8   :  { %369 = dma.done.wait [#allocation4], 256  }
 0x1d9   :  { %370 = vsyncadd [#allocation4], 4294967040 }
 0x1da   :  { %202 = vsyncpa [#allocation3], 1 }
 0x1db   :  { %203 = vsyncpa [#allocation6], 1 }
 0x1dc   :  { %204 = vsyncpa [#allocation4], 1 }

// kernel: tpu_custom_call.1
= control target key start
LH: loop header
LB: loop body
LE: loop exit
PB: predicated region body
PF: predicated region fallthrough
CT: control target
= control target key end

     0   :  { %8 = vsyncpa [#allocation3], 0  ;;  %s444_s0 = inlined_call_operand.hbm [shape: f32[16,128], index: 0, kind: input, shape index: {}]   ;;  %s445_s1 = inlined_call_operand.hbm [shape: f32[128,128], index: 1, kind: input, shape index: {}]   ;;  %s446_s2 = inlined_call_operand.vmem [shape: f32[3,128], index: 2, kind: input, shape index: {}]   ;;  %s447_s3 = inlined_call_operand.hbm [shape: f32[16,128], index: 3, kind: output, shape index: {}]  }
   0x1   :  { %9 = vsyncpa [#allocation6], 0 }
   0x2   :  { %10 = vsyncpa [#allocation4], 0  ;;  %s371_s12 = smov [#allocation2]   ;;  %s299_s16 = scalar_lea.hbm %s444_s0, 256 }
   0x3   :  { %s16_s13 = sshll.u32 %s371_s12, 4  ;;  %p300_p0 = scmp.ne.s32.totalorder %s444_s0, %s299_s16  ;;  %s17_s13 = int_to_ptr.vmem [resolvable:$true] %s16_s13 }
   0x4   :  { %p303_p1 = scmp.lt.u32.totalorder %s299_s16, %s444_s0 }
   0x6   :  { %p305_p2 = pnand %p303_p1, %p300_p0 }
   0x8   :  { %308 = shalt.err (!%p305_p2)
}
   0x9   :  { %s309_s21 = scalar_lea.vmem %s17_s13, 256  ;;  %p314_p4 = scmp.lt.s32.totalorder %s17_s13, %s17_s13 }
   0xa   :  { %p310_p3 = scmp.ne.s32.totalorder %s17_s13, %s309_s21  ;;  %p315_p5 = scmp.lt.s32.totalorder %s309_s21, %s309_s21 }
   0xc   :  { %p316_p6 = por %p315_p5, %p314_p4 }
   0xe   :  { %p317_p7 = pnand %p316_p6, %p310_p3 }
  0x10   :  { %320 = shalt.err (!%p317_p7)
}
  0x11   :  { %s372_s22 = smov 128   ;;  %s373_s23 = smov 8  }
  0x12   :  { %22 = dma.hbm_to_vmem [thread:$0]  %s444_s0, 256, %s17_s13, [#allocation3], %s372_s22, %s372_s22, %s373_s23  }
  0x13   :  { %s374_s26 = smov [#allocation5]   ;;  %s321_s30 = scalar_lea.hbm %s445_s1, 2048 }
  0x14   :  { %s28_s27 = sshll.u32 %s374_s26, 4  ;;  %p322_p8 = scmp.ne.s32.totalorder %s445_s1, %s321_s30  ;;  %s29_s27 = int_to_ptr.vmem [resolvable:$true] %s28_s27 }
  0x15   :  { %p325_p9 = scmp.lt.u32.totalorder %s321_s30, %s445_s1 }
  0x17   :  { %p327_p10 = pnand %p325_p9, %p322_p8 }
  0x19   :  { %330 = shalt.err (!%p327_p10)
}
  0x1a   :  { %s331_s8 = scalar_lea.vmem %s29_s27, 2048  ;;  %p336_p12 = scmp.lt.s32.totalorder %s29_s27, %s29_s27 }
  0x1b   :  { %p332_p11 = scmp.ne.s32.totalorder %s29_s27, %s331_s8  ;;  %p337_p13 = scmp.lt.s32.totalorder %s331_s8, %s331_s8 }
  0x1d   :  { %p338_p0 = por %p337_p13, %p336_p12 }
  0x1f   :  { %p339_p1 = pnand %p338_p0, %p332_p11 }
  0x21   :  { %342 = shalt.err (!%p339_p1)
}
  0x22   :  { %34 = dma.hbm_to_vmem [thread:$0]  %s445_s1, 2048, %s29_s27, [#allocation6], %s372_s22, %s372_s22, %s373_s23  }
  0x23   :  { %365 = dma.done.wait [#allocation3], 256  }
  0x24   :  { %366 = vsyncadd [#allocation3], 4294967040 }
  0x25   :  { %367 = dma.done.wait [#allocation6], 2048  }
  0x26   :  { %368 = vsyncadd [#allocation6], 4294965248  ;;  %v45_v0 = vld [vmem:[#allocation5] sm:$0xff]  ;;  %v46_v1 = vld [vmem:[#allocation5 + $0x8] sm:$0xff]  ;;  %v139_v26 = vlaneseq }
  0x27   :  { %v47_v2 = vld [vmem:[#allocation5 + $0x10] sm:$0xff]  ;;  %v258_v3 = vpack.c.bf16 %v46_v1, %v45_v0  ;;  %v48_v4 = vld [vmem:[#allocation5 + $0x18] sm:$0xff]  ;;  %v49_v6 = vld [vmem:[#allocation5 + $0x20] sm:$0xff] }
  0x28   :  { %v262_v5 = vpack.c.bf16 %v48_v4, %v47_v2  ;;  %v50_v7 = vld [vmem:[#allocation5 + $0x28] sm:$0xff]  ;;  %v43_v9 = vld [vmem:[#allocation2] sm:$0xff]  ;;  %v52_v11 = vld [vmem:[#allocation5 + $0x38] sm:$0xff]  ;;  %v140_v27 = vshrl.u32 %v139_v26, 7 }
  0x29   :  { %259 = vmatprep.subr.bf16.mxu0 %v258_v3  ;;  %v266_v8 = vpack.c.bf16 %v50_v7, %v49_v6  ;;  %v51_v10 = vld [vmem:[#allocation5 + $0x30] sm:$0xff]  ;;  %255 = vmatprep.mubr.f32.mxu0 %v43_v9  ;;  %v53_v13 = vld [vmem:[#allocation5 + $0x40] sm:$0xff]  ;;  %v54_v14 = vld [vmem:[#allocation5 + $0x48] sm:$0xff] }
  0x2a   :  { %261 = vmatpush3.bf16.msra.mxu0 %v258_v3  ;;  %v270_v12 = vpack.c.bf16 %v52_v11, %v51_v10  ;;  %v274_v15 = vpack.c.bf16 %v54_v14, %v53_v13  ;;  %v55_v16 = vld [vmem:[#allocation5 + $0x50] sm:$0xff]  ;;  %v56_v17 = vld [vmem:[#allocation5 + $0x58] sm:$0xff]  ;;  %v57_v19 = vld [vmem:[#allocation5 + $0x60] sm:$0xff]  ;;  %v141_v28 = vsub.s32 0, %v140_v27  ;;  %v175_v55 = vsub.s32 1, %v140_v27 }
  0x2b   :  { %263 = vmatprep.subr.bf16.mxu0 %v262_v5  ;;  %v278_v18 = vpack.c.bf16 %v56_v17, %v55_v16  ;;  %v58_v20 = vld [vmem:[#allocation5 + $0x68] sm:$0xff]  ;;  %v59_v22 = vld [vmem:[#allocation5 + $0x70] sm:$0xff]  ;;  %v60_v23 = vld [vmem:[#allocation5 + $0x78] sm:$0xff]  ;;  %v181_v56 = vsub.s32 2, %v140_v27 }
  0x2c   :  { %v282_v21 = vpack.c.bf16 %v58_v20, %v57_v19  ;;  %v286_v24 = vpack.c.bf16 %v60_v23, %v59_v22  ;;  %v44_v25 = vld [vmem:[#allocation2 + $0x8] sm:$0xff]  ;;  %v136_v29 = vld [vmem:[%s446_s2] sm:$0x7]  ;;  %s375_s2 = smov [#allocation7]  }
  0x2d   :  { %v142_v31 = vrot.slane %v136_v29, %v141_v28  ;;  %v176_v57 = vrot.slane %v136_v29, %v175_v55  ;;  %v182_v61 = vrot.slane %v136_v29, %v181_v56  ;;  %s192_s11 = sshll.u32 %s375_s2, 4  ;;  %s193_s11 = int_to_ptr.vmem [resolvable:$true] %s192_s11 }
  0x2e   :  { %265 = vmatpush3.bf16.msra.mxu0 %v262_v5  ;;  %s343_s12 = scalar_lea.vmem %s193_s11, 256  ;;  %p348_p3 = scmp.lt.s32.totalorder %s193_s11, %s193_s11 }
  0x2f   :  { %267 = vmatprep.subr.bf16.mxu0 %v266_v8  ;;  %p344_p2 = scmp.ne.s32.totalorder %s193_s11, %s343_s12  ;;  %p349_p4 = scmp.lt.s32.totalorder %s343_s12, %s343_s12 }
  0x31   :  { %p350_p5 = por %p349_p4, %p348_p3 }
  0x32   :  { %269 = vmatpush3.bf16.msra.mxu0 %v266_v8 }
  0x33   :  { %271 = vmatprep.subr.bf16.mxu0 %v270_v12  ;;  %p351_p6 = pnand %p350_p5, %p344_p2 }
  0x36   :  { %273 = vmatpush3.bf16.msra.mxu0 %v270_v12 }
  0x37   :  { %275 = vmatprep.subr.bf16.mxu0 %v274_v15 }
  0x3a   :  { %277 = vmatpush3.bf16.msra.mxu0 %v274_v15 }
  0x3b   :  { %279 = vmatprep.subr.bf16.mxu0 %v278_v18 }
  0x3e   :  { %281 = vmatpush3.bf16.msra.mxu0 %v278_v18 }
  0x3f   :  { %283 = vmatprep.subr.bf16.mxu0 %v282_v21 }
  0x42   :  { %285 = vmatpush3.bf16.msra.mxu0 %v282_v21 }
  0x43   :  { %287 = vmatprep.subr.bf16.mxu0 %v286_v24 }
  0x46   :  { %289 = vmatpush3.bf16.msra.mxu0 %v286_v24 }
  0x49   :  { %256 = vmatmul.mubr.f32.vlgmr.msra.gmra.mrb[0].mxu0 %v44_v25 }
 0x11c   :  { %v257_v30 = vpop.f32.mrb[0].mxu0 }
 0x11d   :  { %v127_v32 = vpop.f32.mrb[1].mxu0  ;;  %v138_v33 = vadd.f32 %v257_v30, %v44_v25 }
 0x11e   :  { %v137_v34 = vadd.f32 %v127_v32, %v43_v9 }
 0x11f   :  { %v144_v36 = vadd.f32 %v142_v31, %v138_v33 }
 0x120   :  { %v143_v35 = vadd.f32 %v142_v31, %v137_v34 }
 0x121   :  { %v150_v38 = vmul.f32 %v144_v36, %v144_v36 }
 0x122   :  { %145 = vadd.xlane.f32.xlu0 %v143_v35  ;;  %v149_v37 = vmul.f32 %v143_v35, %v143_v35 }
 0x124   :  { %151 = vadd.xlane.f32.xlu1 %v149_v37 }
 0x126   :  { %147 = vadd.xlane.f32.xlu0 %v144_v36 }
 0x128   :  { %153 = vadd.xlane.f32.xlu1 %v150_v38 }
 0x1af   :  { %v146_v39 = vpop.xlane.xlu0 %145 }
 0x1b0   :  { %v155_v40 = vmul.f32 0.0078125, %v146_v39 }
 0x1b1   :  { %v152_v41 = vpop.xlane.xlu1 %151 }
 0x1b2   :  { %v159_v42 = vmul.f32 %v155_v40, %v155_v40  ;;  %v157_v43 = vmul.f32 0.0078125, %v152_v41  ;;  %v165_v58 = vsub.f32 %v143_v35, %v155_v40 }
 0x1b3   :  { %v148_v44 = vpop.xlane.xlu0 %147 }
 0x1b4   :  { %v161_v45 = vsub.f32 %v157_v43, %v159_v42  ;;  %v156_v46 = vmul.f32 0.0078125, %v148_v44 }
 0x1b5   :  { %v154_v47 = vpop.xlane.xlu1 %153 }
 0x1b6   :  { %v163_v48 = vmax.f32 %v161_v45, 0.0  ;;  %v160_v49 = vmul.f32 %v156_v46, %v156_v46  ;;  %v158_v50 = vmul.f32 0.0078125, %v154_v47  ;;  %v166_v62 = vsub.f32 %v144_v36, %v156_v46 }
 0x1b8   :  { %v167_v51 = vadd.f32 1e-05, %v163_v48  ;;  %v162_v52 = vsub.f32 %v158_v50, %v160_v49 }
 0x1ba   :  { %295 = vrsqrt.f32 %v167_v51  ;;  %v164_v53 = vmax.f32 %v162_v52, 0.0 }
 0x1bc   :  { %v168_v54 = vadd.f32 1e-05, %v164_v53 }
 0x1be   :  { %297 = vrsqrt.f32 %v168_v54 }
 0x1c4   :  { %v296_v59 = vpop.eup %295 }
 0x1c5   :  { %v171_v60 = vmul.f32 %v296_v59, %v165_v58 }
 0x1c7   :  { %v177_v63 = vmul.f32 %v176_v57, %v171_v60 }
 0x1c8   :  { %v298_v0 = vpop.eup %297 }
 0x1c9   :  { %v172_v1 = vmul.f32 %v298_v0, %v166_v62  ;;  %v183_v2 = vadd.f32 %v182_v61, %v177_v63 }
 0x1cb   :  { %v178_v3 = vmul.f32 %v176_v57, %v172_v1  ;;  %185 = vst [vmem:[#allocation7] sm:$0xff] %v183_v2 }
 0x1cd   :  { %v184_v4 = vadd.f32 %v182_v61, %v178_v3 }
 0x1cf   :  { %186 = vst [vmem:[#allocation7 + $0x8] sm:$0xff] %v184_v4 }
 0x1d0   :  { %354 = shalt.err (!%p351_p6)
}
 0x1d1   :  { %s355_s15 = scalar_lea.hbm %s447_s3, 256 }
 0x1d2   :  { %p356_p7 = scmp.ne.s32.totalorder %s447_s3, %s355_s15  ;;  %p359_p8 = scmp.lt.u32.totalorder %s355_s15, %s447_s3 }
 0x1d4   :  { %p361_p9 = pnand %p359_p8, %p356_p7 }
 0x1d6   :  { %364 = shalt.err (!%p361_p9)
}
 0x1d7   :  { %198 = dma.vmem_to_hbm [thread:$0]  %s193_s11, 256, %s447_s3, [#allocation4], %s372_s22, %s372_s22, %s373_s23  }
 0x1d8   :  { %369 = dma.done.wait [#allocation4], 256  }
 0x1d9   :  { %370 = vsyncadd [#allocation4], 4294967040 }
 0x1da   :  { %202 = vsyncpa [#allocation3], 1 }
 0x1db   :  { %203 = vsyncpa [#allocation6], 1 }
 0x1dc   :  { %204 = vsyncpa [#allocation4], 1 }

</bundles_post_ra>
